<compile_context>
chip_gen: v7x
topology: tpu7x:2x2x1
jax: 0.10.0
libtpu: 0.0.40
codegen_flags: <defaults>
</compile_context>

<pallas_src>
import jax
import jax.numpy as jnp
from jax.experimental import pallas as pl
from jax.experimental.pallas import tpu as pltpu


def _split_planes_dma_kernel(x_ref, re_ref, im_ref, sems):
    """Pure-DMA split of x[B, 2, N] into re[B, N] and im[B, N].

    All refs are raw HBM refs (memory_space=pl.ANY).  Grid step 0 copies the real
    planes, grid step 1 the imaginary planes (one strided HBM->HBM DMA each:
    B rows of N contiguous f32, source row stride 2*N).
    """
    c = pl.program_id(0)

    @pl.when(c == 0)
    def _():
        cp = pltpu.make_async_copy(x_ref.at[:, 0], re_ref, sems.at[0])
        cp.start()
        cp.wait()

    @pl.when(c == 1)
    def _():
        cp = pltpu.make_async_copy(x_ref.at[:, 1], im_ref, sems.at[1])
        cp.start()
        cp.wait()


@jax.jit
def complex_casorati_constraint(x: jax.Array) -> jax.Array:
    """x: f32[B, 2, H, W, T]  ->  complex64[B*H*W, T]"""
    B, C, H, W, T = x.shape
    assert C == 2, "channel dim 1 must hold (real, imag)"
    N = H * W * T
    itemsize = x.dtype.itemsize

    # Free metadata reshape (contiguous): each (real|imag) plane is one row of N.
    x3 = x.reshape(B, 2, N)
    plane = jax.ShapeDtypeStruct((B, N), x.dtype)

    re, im = pl.pallas_call(
        _split_planes_dma_kernel,
        out_shape=(plane, plane),
        grid_spec=pltpu.PrefetchScalarGridSpec(
            num_scalar_prefetch=0,
            grid=(2,),
            in_specs=[pl.BlockSpec(memory_space=pl.ANY)],
            out_specs=[
                pl.BlockSpec(memory_space=pl.ANY),
                pl.BlockSpec(memory_space=pl.ANY),
            ],
            scratch_shapes=[pltpu.SemaphoreType.DMA((2,))],
        ),
        compiler_params=pltpu.CompilerParams(
            dimension_semantics=("parallel",),
        ),
        cost_estimate=pl.CostEstimate(
            flops=0,
            transcendentals=0,
            bytes_accessed=2 * x.size * itemsize,  # read x + write both planes
        ),
    )(x3)

    # Casorati matrix shape (voxels x time) — contiguous reshape, pure metadata.
    re = re.reshape(B * H * W, T)
    im = im.reshape(B * H * W, T)

    # TODO(synk): unavoidable second HBM pass — XLA must materialise complex64 since
    # Mosaic cannot emit it; callers that accept planar (re, im) should take the
    # kernel outputs directly and skip this.
    return jax.lax.complex(re, im)


if __name__ == "__main__":
    # Small deterministic example consistent with the module:
    # batch=2, 2 complex channels (real/imag), spatial 16x16, time frames=8.
    key = jax.random.PRNGKey(0)
    B, H, W, T = 2, 16, 16, 8
    x = jax.random.normal(key, (B, 2, H, W, T), dtype=jnp.float32)

    out = complex_casorati_constraint(x)
    out = jax.block_until_ready(out)

    # Reference (pure JAX) check of the forward semantics.
    ref = (x[:, 0] + 1j * x[:, 1]).astype(jnp.complex64).reshape(-1, T)
    assert out.shape == (B * H * W, T)
    assert out.dtype == jnp.complex64
    assert jnp.allclose(out, ref)

    print("KERNEL_OK")
</pallas_src>

<mosaic_0001>
module attributes {stable_mosaic.version = 11 : i64} {
  func.func @_split_planes_dma_kernel(%arg0: i32, %arg1: memref<2x2x2048xf32, #tpu.memory_space<any>>, %arg2: memref<2x2048xf32, #tpu.memory_space<any>>, %arg3: memref<2x2048xf32, #tpu.memory_space<any>>, %arg4: memref<2x!tpu.dma_semaphore, #tpu.memory_space<semaphore_mem>>) attributes {dimension_semantics = [#tpu.dimension_semantics<parallel>], iteration_bounds = array<i64: 2>, scalar_prefetch = 0 : i64, scratch_operands = 1 : i64, tpu.core_type = #tpu.core_type<tc>, window_params = [{}, {}, {}]} {
    %c0_i32 = arith.constant 0 : i32
    %0 = arith.cmpi eq, %arg0, %c0_i32 : i32
    %1 = arith.extui %0 : i1 to i32
    %c0_i32_0 = arith.constant 0 : i32
    %2 = arith.cmpi ne, %1, %c0_i32_0 : i32
    scf.if %2 {
      %c0_i32_2 = arith.constant 0 : i32
      %c0_i32_3 = arith.constant 0 : i32
      %c0_i32_4 = arith.constant 0 : i32
      %c0_i32_5 = arith.constant 0 : i32
      %6 = tpu.memref_slice %arg1[%c0_i32_4, %c0_i32_2, %c0_i32_5] : memref<2x2x2048xf32, #tpu.memory_space<any>> -> memref<2x1x2048xf32, #tpu.memory_space<any>>
      %7 = tpu.memref_squeeze %6 : memref<2x1x2048xf32, #tpu.memory_space<any>> -> memref<2x2048xf32, #tpu.memory_space<any>>
      %8 = tpu.memref_slice %arg4[%c0_i32_3] : memref<2x!tpu.dma_semaphore, #tpu.memory_space<semaphore_mem>> -> memref<1x!tpu.dma_semaphore, #tpu.memory_space<semaphore_mem>>
      %9 = tpu.memref_squeeze %8 : memref<1x!tpu.dma_semaphore, #tpu.memory_space<semaphore_mem>> -> memref<!tpu.dma_semaphore, #tpu.memory_space<semaphore_mem>>
      tpu.enqueue_dma source(%7 : memref<2x2048xf32, #tpu.memory_space<any>>) target(%arg2 : memref<2x2048xf32, #tpu.memory_space<any>>) target_semaphore(%9 : memref<!tpu.dma_semaphore, #tpu.memory_space<semaphore_mem>>)
      %c0_i32_6 = arith.constant 0 : i32
      %c0_i32_7 = arith.constant 0 : i32
      %c0_i32_8 = arith.constant 0 : i32
      %c0_i32_9 = arith.constant 0 : i32
      %10 = tpu.memref_slice %arg1[%c0_i32_8, %c0_i32_6, %c0_i32_9] : memref<2x2x2048xf32, #tpu.memory_space<any>> -> memref<2x1x2048xf32, #tpu.memory_space<any>>
      %11 = tpu.memref_squeeze %10 : memref<2x1x2048xf32, #tpu.memory_space<any>> -> memref<2x2048xf32, #tpu.memory_space<any>>
      %12 = tpu.memref_slice %arg4[%c0_i32_7] : memref<2x!tpu.dma_semaphore, #tpu.memory_space<semaphore_mem>> -> memref<1x!tpu.dma_semaphore, #tpu.memory_space<semaphore_mem>>
      %13 = tpu.memref_squeeze %12 : memref<1x!tpu.dma_semaphore, #tpu.memory_space<semaphore_mem>> -> memref<!tpu.dma_semaphore, #tpu.memory_space<semaphore_mem>>
      tpu.wait_dma2 semaphore(%13 : memref<!tpu.dma_semaphore, #tpu.memory_space<semaphore_mem>>) src(%11 : memref<2x2048xf32, #tpu.memory_space<any>>) dst(%arg2 : memref<2x2048xf32, #tpu.memory_space<any>>)
    } else {
    }
    %c1_i32 = arith.constant 1 : i32
    %3 = arith.cmpi eq, %arg0, %c1_i32 : i32
    %4 = arith.extui %3 : i1 to i32
    %c0_i32_1 = arith.constant 0 : i32
    %5 = arith.cmpi ne, %4, %c0_i32_1 : i32
    scf.if %5 {
      %c1_i32_2 = arith.constant 1 : i32
      %c1_i32_3 = arith.constant 1 : i32
      %c0_i32_4 = arith.constant 0 : i32
      %c0_i32_5 = arith.constant 0 : i32
      %6 = tpu.memref_slice %arg1[%c0_i32_4, %c1_i32_2, %c0_i32_5] : memref<2x2x2048xf32, #tpu.memory_space<any>> -> memref<2x1x2048xf32, #tpu.memory_space<any>>
      %7 = tpu.memref_squeeze %6 : memref<2x1x2048xf32, #tpu.memory_space<any>> -> memref<2x2048xf32, #tpu.memory_space<any>>
      %8 = tpu.memref_slice %arg4[%c1_i32_3] : memref<2x!tpu.dma_semaphore, #tpu.memory_space<semaphore_mem>> -> memref<1x!tpu.dma_semaphore, #tpu.memory_space<semaphore_mem>>
      %9 = tpu.memref_squeeze %8 : memref<1x!tpu.dma_semaphore, #tpu.memory_space<semaphore_mem>> -> memref<!tpu.dma_semaphore, #tpu.memory_space<semaphore_mem>>
      tpu.enqueue_dma source(%7 : memref<2x2048xf32, #tpu.memory_space<any>>) target(%arg3 : memref<2x2048xf32, #tpu.memory_space<any>>) target_semaphore(%9 : memref<!tpu.dma_semaphore, #tpu.memory_space<semaphore_mem>>)
      %c1_i32_6 = arith.constant 1 : i32
      %c1_i32_7 = arith.constant 1 : i32
      %c0_i32_8 = arith.constant 0 : i32
      %c0_i32_9 = arith.constant 0 : i32
      %10 = tpu.memref_slice %arg1[%c0_i32_8, %c1_i32_6, %c0_i32_9] : memref<2x2x2048xf32, #tpu.memory_space<any>> -> memref<2x1x2048xf32, #tpu.memory_space<any>>
      %11 = tpu.memref_squeeze %10 : memref<2x1x2048xf32, #tpu.memory_space<any>> -> memref<2x2048xf32, #tpu.memory_space<any>>
      %12 = tpu.memref_slice %arg4[%c1_i32_7] : memref<2x!tpu.dma_semaphore, #tpu.memory_space<semaphore_mem>> -> memref<1x!tpu.dma_semaphore, #tpu.memory_space<semaphore_mem>>
      %13 = tpu.memref_squeeze %12 : memref<1x!tpu.dma_semaphore, #tpu.memory_space<semaphore_mem>> -> memref<!tpu.dma_semaphore, #tpu.memory_space<semaphore_mem>>
      tpu.wait_dma2 semaphore(%13 : memref<!tpu.dma_semaphore, #tpu.memory_space<semaphore_mem>>) src(%11 : memref<2x2048xf32, #tpu.memory_space<any>>) dst(%arg3 : memref<2x2048xf32, #tpu.memory_space<any>>)
    } else {
    }
    return
  }
}

</mosaic_0001>

<bundles_post_ra>
// kernel: custom-call
= control target key start
LH: loop header
LB: loop body
LE: loop exit
PB: predicated region body
PF: predicated region fallthrough
CT: control target
= control target key end

     0   :  { %s1612_s0 = inlined_call_operand.vmem [shape: f32[512,8], index: 0, kind: input, shape index: {}]   ;;  %s1613_s2 = inlined_call_operand.vmem [shape: c64[512,8], index: 2, kind: output, shape index: {}]   ;;  %s1614_s1 = inlined_call_operand.vmem [shape: f32[512,8], index: 1, kind: input, shape index: {}]  }
   0x1   :  { %v5_v0 = vld [vmem:[%s1612_s0] sm:$0xff]  ;;  %v576_v1 = vld [vmem:[%s1612_s0 + $0x8] sm:$0xff]  ;;  %v578_v2 = vld [vmem:[%s1612_s0 + $0x10] sm:$0xff] }
   0x2   :  { %6 = vst [vmem:[%s1613_s2] sm:$0xff] %v5_v0  ;;  %577 = vst [vmem:[%s1613_s2 + $0x8] sm:$0xff] %v576_v1  ;;  %v580_v3 = vld [vmem:[%s1612_s0 + $0x18] sm:$0xff]  ;;  %v582_v4 = vld [vmem:[%s1612_s0 + $0x20] sm:$0xff] }
   0x3   :  { %579 = vst [vmem:[%s1613_s2 + $0x10] sm:$0xff] %v578_v2  ;;  %v584_v5 = vld [vmem:[%s1612_s0 + $0x28] sm:$0xff]  ;;  %581 = vst [vmem:[%s1613_s2 + $0x18] sm:$0xff] %v580_v3  ;;  %v586_v6 = vld [vmem:[%s1612_s0 + $0x30] sm:$0xff] }
   0x4   :  { %583 = vst [vmem:[%s1613_s2 + $0x20] sm:$0xff] %v582_v4  ;;  %585 = vst [vmem:[%s1613_s2 + $0x28] sm:$0xff] %v584_v5  ;;  %v588_v7 = vld [vmem:[%s1612_s0 + $0x38] sm:$0xff]  ;;  %v590_v8 = vld [vmem:[%s1612_s0 + $0x40] sm:$0xff] }
   0x5   :  { %587 = vst [vmem:[%s1613_s2 + $0x30] sm:$0xff] %v586_v6  ;;  %589 = vst [vmem:[%s1613_s2 + $0x38] sm:$0xff] %v588_v7  ;;  %v592_v9 = vld [vmem:[%s1612_s0 + $0x48] sm:$0xff]  ;;  %v594_v10 = vld [vmem:[%s1612_s0 + $0x50] sm:$0xff] }
   0x6   :  { %591 = vst [vmem:[%s1613_s2 + $0x40] sm:$0xff] %v590_v8  ;;  %v596_v11 = vld [vmem:[%s1612_s0 + $0x58] sm:$0xff]  ;;  %593 = vst [vmem:[%s1613_s2 + $0x48] sm:$0xff] %v592_v9  ;;  %v598_v12 = vld [vmem:[%s1612_s0 + $0x60] sm:$0xff] }
   0x7   :  { %595 = vst [vmem:[%s1613_s2 + $0x50] sm:$0xff] %v594_v10  ;;  %597 = vst [vmem:[%s1613_s2 + $0x58] sm:$0xff] %v596_v11  ;;  %v600_v13 = vld [vmem:[%s1612_s0 + $0x68] sm:$0xff]  ;;  %v602_v14 = vld [vmem:[%s1612_s0 + $0x70] sm:$0xff] }
   0x8   :  { %599 = vst [vmem:[%s1613_s2 + $0x60] sm:$0xff] %v598_v12  ;;  %601 = vst [vmem:[%s1613_s2 + $0x68] sm:$0xff] %v600_v13  ;;  %v604_v15 = vld [vmem:[%s1612_s0 + $0x78] sm:$0xff]  ;;  %v606_v16 = vld [vmem:[%s1612_s0 + $0x80] sm:$0xff] }
   0x9   :  { %603 = vst [vmem:[%s1613_s2 + $0x70] sm:$0xff] %v602_v14  ;;  %v608_v17 = vld [vmem:[%s1612_s0 + $0x88] sm:$0xff]  ;;  %605 = vst [vmem:[%s1613_s2 + $0x78] sm:$0xff] %v604_v15  ;;  %v610_v18 = vld [vmem:[%s1612_s0 + $0x90] sm:$0xff] }
   0xa   :  { %607 = vst [vmem:[%s1613_s2 + $0x80] sm:$0xff] %v606_v16  ;;  %609 = vst [vmem:[%s1613_s2 + $0x88] sm:$0xff] %v608_v17  ;;  %v612_v19 = vld [vmem:[%s1612_s0 + $0x98] sm:$0xff]  ;;  %v614_v20 = vld [vmem:[%s1612_s0 + $0xa0] sm:$0xff] }
   0xb   :  { %611 = vst [vmem:[%s1613_s2 + $0x90] sm:$0xff] %v610_v18  ;;  %613 = vst [vmem:[%s1613_s2 + $0x98] sm:$0xff] %v612_v19  ;;  %v616_v21 = vld [vmem:[%s1612_s0 + $0xa8] sm:$0xff]  ;;  %v618_v22 = vld [vmem:[%s1612_s0 + $0xb0] sm:$0xff] }
   0xc   :  { %615 = vst [vmem:[%s1613_s2 + $0xa0] sm:$0xff] %v614_v20  ;;  %v620_v23 = vld [vmem:[%s1612_s0 + $0xb8] sm:$0xff]  ;;  %617 = vst [vmem:[%s1613_s2 + $0xa8] sm:$0xff] %v616_v21  ;;  %v622_v24 = vld [vmem:[%s1612_s0 + $0xc0] sm:$0xff] }
   0xd   :  { %619 = vst [vmem:[%s1613_s2 + $0xb0] sm:$0xff] %v618_v22  ;;  %621 = vst [vmem:[%s1613_s2 + $0xb8] sm:$0xff] %v620_v23  ;;  %v624_v25 = vld [vmem:[%s1612_s0 + $0xc8] sm:$0xff]  ;;  %v626_v26 = vld [vmem:[%s1612_s0 + $0xd0] sm:$0xff] }
   0xe   :  { %623 = vst [vmem:[%s1613_s2 + $0xc0] sm:$0xff] %v622_v24  ;;  %625 = vst [vmem:[%s1613_s2 + $0xc8] sm:$0xff] %v624_v25  ;;  %v628_v27 = vld [vmem:[%s1612_s0 + $0xd8] sm:$0xff]  ;;  %v630_v28 = vld [vmem:[%s1612_s0 + $0xe0] sm:$0xff] }
   0xf   :  { %627 = vst [vmem:[%s1613_s2 + $0xd0] sm:$0xff] %v626_v26  ;;  %v632_v29 = vld [vmem:[%s1612_s0 + $0xe8] sm:$0xff]  ;;  %629 = vst [vmem:[%s1613_s2 + $0xd8] sm:$0xff] %v628_v27  ;;  %v634_v30 = vld [vmem:[%s1612_s0 + $0xf0] sm:$0xff] }
  0x10   :  { %631 = vst [vmem:[%s1613_s2 + $0xe0] sm:$0xff] %v630_v28  ;;  %633 = vst [vmem:[%s1613_s2 + $0xe8] sm:$0xff] %v632_v29  ;;  %v636_v31 = vld [vmem:[%s1612_s0 + $0xf8] sm:$0xff]  ;;  %v638_v32 = vld [vmem:[%s1612_s0 + $0x100] sm:$0xff] }
  0x11   :  { %635 = vst [vmem:[%s1613_s2 + $0xf0] sm:$0xff] %v634_v30  ;;  %637 = vst [vmem:[%s1613_s2 + $0xf8] sm:$0xff] %v636_v31  ;;  %v640_v33 = vld [vmem:[%s1612_s0 + $0x108] sm:$0xff]  ;;  %v642_v34 = vld [vmem:[%s1612_s0 + $0x110] sm:$0xff] }
  0x12   :  { %639 = vst [vmem:[%s1613_s2 + $0x100] sm:$0xff] %v638_v32  ;;  %v644_v35 = vld [vmem:[%s1612_s0 + $0x118] sm:$0xff]  ;;  %641 = vst [vmem:[%s1613_s2 + $0x108] sm:$0xff] %v640_v33  ;;  %v646_v36 = vld [vmem:[%s1612_s0 + $0x120] sm:$0xff] }
  0x13   :  { %643 = vst [vmem:[%s1613_s2 + $0x110] sm:$0xff] %v642_v34  ;;  %645 = vst [vmem:[%s1613_s2 + $0x118] sm:$0xff] %v644_v35  ;;  %v648_v37 = vld [vmem:[%s1612_s0 + $0x128] sm:$0xff]  ;;  %v650_v38 = vld [vmem:[%s1612_s0 + $0x130] sm:$0xff] }
  0x14   :  { %647 = vst [vmem:[%s1613_s2 + $0x120] sm:$0xff] %v646_v36  ;;  %649 = vst [vmem:[%s1613_s2 + $0x128] sm:$0xff] %v648_v37  ;;  %v652_v39 = vld [vmem:[%s1612_s0 + $0x138] sm:$0xff]  ;;  %v654_v40 = vld [vmem:[%s1612_s0 + $0x140] sm:$0xff] }
  0x15   :  { %651 = vst [vmem:[%s1613_s2 + $0x130] sm:$0xff] %v650_v38  ;;  %v656_v41 = vld [vmem:[%s1612_s0 + $0x148] sm:$0xff]  ;;  %653 = vst [vmem:[%s1613_s2 + $0x138] sm:$0xff] %v652_v39  ;;  %v658_v42 = vld [vmem:[%s1612_s0 + $0x150] sm:$0xff] }
  0x16   :  { %655 = vst [vmem:[%s1613_s2 + $0x140] sm:$0xff] %v654_v40  ;;  %657 = vst [vmem:[%s1613_s2 + $0x148] sm:$0xff] %v656_v41  ;;  %v660_v43 = vld [vmem:[%s1612_s0 + $0x158] sm:$0xff]  ;;  %v662_v44 = vld [vmem:[%s1612_s0 + $0x160] sm:$0xff] }
  0x17   :  { %659 = vst [vmem:[%s1613_s2 + $0x150] sm:$0xff] %v658_v42  ;;  %661 = vst [vmem:[%s1613_s2 + $0x158] sm:$0xff] %v660_v43  ;;  %v664_v45 = vld [vmem:[%s1612_s0 + $0x168] sm:$0xff]  ;;  %v666_v46 = vld [vmem:[%s1612_s0 + $0x170] sm:$0xff] }
  0x18   :  { %663 = vst [vmem:[%s1613_s2 + $0x160] sm:$0xff] %v662_v44  ;;  %v668_v47 = vld [vmem:[%s1612_s0 + $0x178] sm:$0xff]  ;;  %665 = vst [vmem:[%s1613_s2 + $0x168] sm:$0xff] %v664_v45  ;;  %v670_v48 = vld [vmem:[%s1612_s0 + $0x180] sm:$0xff] }
  0x19   :  { %667 = vst [vmem:[%s1613_s2 + $0x170] sm:$0xff] %v666_v46  ;;  %669 = vst [vmem:[%s1613_s2 + $0x178] sm:$0xff] %v668_v47  ;;  %v672_v49 = vld [vmem:[%s1612_s0 + $0x188] sm:$0xff]  ;;  %v674_v50 = vld [vmem:[%s1612_s0 + $0x190] sm:$0xff] }
  0x1a   :  { %671 = vst [vmem:[%s1613_s2 + $0x180] sm:$0xff] %v670_v48  ;;  %673 = vst [vmem:[%s1613_s2 + $0x188] sm:$0xff] %v672_v49  ;;  %v676_v51 = vld [vmem:[%s1612_s0 + $0x198] sm:$0xff]  ;;  %v678_v52 = vld [vmem:[%s1612_s0 + $0x1a0] sm:$0xff] }
  0x1b   :  { %675 = vst [vmem:[%s1613_s2 + $0x190] sm:$0xff] %v674_v50  ;;  %v680_v53 = vld [vmem:[%s1612_s0 + $0x1a8] sm:$0xff]  ;;  %677 = vst [vmem:[%s1613_s2 + $0x198] sm:$0xff] %v676_v51  ;;  %v682_v54 = vld [vmem:[%s1612_s0 + $0x1b0] sm:$0xff] }
  0x1c   :  { %679 = vst [vmem:[%s1613_s2 + $0x1a0] sm:$0xff] %v678_v52  ;;  %681 = vst [vmem:[%s1613_s2 + $0x1a8] sm:$0xff] %v680_v53  ;;  %v684_v55 = vld [vmem:[%s1612_s0 + $0x1b8] sm:$0xff]  ;;  %v686_v56 = vld [vmem:[%s1612_s0 + $0x1c0] sm:$0xff] }
  0x1d   :  { %683 = vst [vmem:[%s1613_s2 + $0x1b0] sm:$0xff] %v682_v54  ;;  %685 = vst [vmem:[%s1613_s2 + $0x1b8] sm:$0xff] %v684_v55  ;;  %v688_v57 = vld [vmem:[%s1612_s0 + $0x1c8] sm:$0xff]  ;;  %v690_v58 = vld [vmem:[%s1612_s0 + $0x1d0] sm:$0xff] }
  0x1e   :  { %687 = vst [vmem:[%s1613_s2 + $0x1c0] sm:$0xff] %v686_v56  ;;  %v692_v59 = vld [vmem:[%s1612_s0 + $0x1d8] sm:$0xff]  ;;  %689 = vst [vmem:[%s1613_s2 + $0x1c8] sm:$0xff] %v688_v57  ;;  %v694_v60 = vld [vmem:[%s1612_s0 + $0x1e0] sm:$0xff] }
  0x1f   :  { %691 = vst [vmem:[%s1613_s2 + $0x1d0] sm:$0xff] %v690_v58  ;;  %693 = vst [vmem:[%s1613_s2 + $0x1d8] sm:$0xff] %v692_v59  ;;  %v696_v61 = vld [vmem:[%s1612_s0 + $0x1e8] sm:$0xff]  ;;  %v698_v62 = vld [vmem:[%s1612_s0 + $0x1f0] sm:$0xff] }
  0x20   :  { %695 = vst [vmem:[%s1613_s2 + $0x1e0] sm:$0xff] %v694_v60  ;;  %697 = vst [vmem:[%s1613_s2 + $0x1e8] sm:$0xff] %v696_v61  ;;  %v700_v63 = vld [vmem:[%s1612_s0 + $0x1f8] sm:$0xff]  ;;  %v259_v0 = vld [vmem:[%s1614_s1] sm:$0xff] }
  0x21   :  { %699 = vst [vmem:[%s1613_s2 + $0x1f0] sm:$0xff] %v698_v62  ;;  %v703_v1 = vld [vmem:[%s1614_s1 + $0x8] sm:$0xff]  ;;  %701 = vst [vmem:[%s1613_s2 + $0x1f8] sm:$0xff] %v700_v63  ;;  %v705_v2 = vld [vmem:[%s1614_s1 + $0x10] sm:$0xff] }
  0x22   :  { %702 = vst [vmem:[%s1613_s2 + $0x200] sm:$0xff] %v259_v0  ;;  %704 = vst [vmem:[%s1613_s2 + $0x208] sm:$0xff] %v703_v1  ;;  %v707_v3 = vld [vmem:[%s1614_s1 + $0x18] sm:$0xff]  ;;  %v709_v4 = vld [vmem:[%s1614_s1 + $0x20] sm:$0xff] }
  0x23   :  { %706 = vst [vmem:[%s1613_s2 + $0x210] sm:$0xff] %v705_v2  ;;  %708 = vst [vmem:[%s1613_s2 + $0x218] sm:$0xff] %v707_v3  ;;  %v711_v5 = vld [vmem:[%s1614_s1 + $0x28] sm:$0xff]  ;;  %v713_v6 = vld [vmem:[%s1614_s1 + $0x30] sm:$0xff] }
  0x24   :  { %710 = vst [vmem:[%s1613_s2 + $0x220] sm:$0xff] %v709_v4  ;;  %v715_v7 = vld [vmem:[%s1614_s1 + $0x38] sm:$0xff]  ;;  %712 = vst [vmem:[%s1613_s2 + $0x228] sm:$0xff] %v711_v5  ;;  %v717_v8 = vld [vmem:[%s1614_s1 + $0x40] sm:$0xff] }
  0x25   :  { %714 = vst [vmem:[%s1613_s2 + $0x230] sm:$0xff] %v713_v6  ;;  %716 = vst [vmem:[%s1613_s2 + $0x238] sm:$0xff] %v715_v7  ;;  %v719_v9 = vld [vmem:[%s1614_s1 + $0x48] sm:$0xff]  ;;  %v721_v10 = vld [vmem:[%s1614_s1 + $0x50] sm:$0xff] }
  0x26   :  { %718 = vst [vmem:[%s1613_s2 + $0x240] sm:$0xff] %v717_v8  ;;  %720 = vst [vmem:[%s1613_s2 + $0x248] sm:$0xff] %v719_v9  ;;  %v723_v11 = vld [vmem:[%s1614_s1 + $0x58] sm:$0xff]  ;;  %v725_v12 = vld [vmem:[%s1614_s1 + $0x60] sm:$0xff] }
  0x27   :  { %722 = vst [vmem:[%s1613_s2 + $0x250] sm:$0xff] %v721_v10  ;;  %v727_v13 = vld [vmem:[%s1614_s1 + $0x68] sm:$0xff]  ;;  %724 = vst [vmem:[%s1613_s2 + $0x258] sm:$0xff] %v723_v11  ;;  %v729_v14 = vld [vmem:[%s1614_s1 + $0x70] sm:$0xff] }
  0x28   :  { %726 = vst [vmem:[%s1613_s2 + $0x260] sm:$0xff] %v725_v12  ;;  %728 = vst [vmem:[%s1613_s2 + $0x268] sm:$0xff] %v727_v13  ;;  %v731_v15 = vld [vmem:[%s1614_s1 + $0x78] sm:$0xff]  ;;  %v733_v16 = vld [vmem:[%s1614_s1 + $0x80] sm:$0xff] }
  0x29   :  { %730 = vst [vmem:[%s1613_s2 + $0x270] sm:$0xff] %v729_v14  ;;  %732 = vst [vmem:[%s1613_s2 + $0x278] sm:$0xff] %v731_v15  ;;  %v735_v17 = vld [vmem:[%s1614_s1 + $0x88] sm:$0xff]  ;;  %v737_v18 = vld [vmem:[%s1614_s1 + $0x90] sm:$0xff] }
  0x2a   :  { %734 = vst [vmem:[%s1613_s2 + $0x280] sm:$0xff] %v733_v16  ;;  %v739_v19 = vld [vmem:[%s1614_s1 + $0x98] sm:$0xff]  ;;  %736 = vst [vmem:[%s1613_s2 + $0x288] sm:$0xff] %v735_v17  ;;  %v741_v20 = vld [vmem:[%s1614_s1 + $0xa0] sm:$0xff] }
  0x2b   :  { %738 = vst [vmem:[%s1613_s2 + $0x290] sm:$0xff] %v737_v18  ;;  %740 = vst [vmem:[%s1613_s2 + $0x298] sm:$0xff] %v739_v19  ;;  %v743_v21 = vld [vmem:[%s1614_s1 + $0xa8] sm:$0xff]  ;;  %v745_v22 = vld [vmem:[%s1614_s1 + $0xb0] sm:$0xff] }
  0x2c   :  { %742 = vst [vmem:[%s1613_s2 + $0x2a0] sm:$0xff] %v741_v20  ;;  %744 = vst [vmem:[%s1613_s2 + $0x2a8] sm:$0xff] %v743_v21  ;;  %v747_v23 = vld [vmem:[%s1614_s1 + $0xb8] sm:$0xff]  ;;  %v749_v24 = vld [vmem:[%s1614_s1 + $0xc0] sm:$0xff] }
  0x2d   :  { %746 = vst [vmem:[%s1613_s2 + $0x2b0] sm:$0xff] %v745_v22  ;;  %v751_v25 = vld [vmem:[%s1614_s1 + $0xc8] sm:$0xff]  ;;  %748 = vst [vmem:[%s1613_s2 + $0x2b8] sm:$0xff] %v747_v23  ;;  %v753_v26 = vld [vmem:[%s1614_s1 + $0xd0] sm:$0xff] }
  0x2e   :  { %750 = vst [vmem:[%s1613_s2 + $0x2c0] sm:$0xff] %v749_v24  ;;  %752 = vst [vmem:[%s1613_s2 + $0x2c8] sm:$0xff] %v751_v25  ;;  %v755_v27 = vld [vmem:[%s1614_s1 + $0xd8] sm:$0xff]  ;;  %v757_v28 = vld [vmem:[%s1614_s1 + $0xe0] sm:$0xff] }
  0x2f   :  { %754 = vst [vmem:[%s1613_s2 + $0x2d0] sm:$0xff] %v753_v26  ;;  %756 = vst [vmem:[%s1613_s2 + $0x2d8] sm:$0xff] %v755_v27  ;;  %v759_v29 = vld [vmem:[%s1614_s1 + $0xe8] sm:$0xff]  ;;  %v761_v30 = vld [vmem:[%s1614_s1 + $0xf0] sm:$0xff] }
  0x30   :  { %758 = vst [vmem:[%s1613_s2 + $0x2e0] sm:$0xff] %v757_v28  ;;  %v763_v31 = vld [vmem:[%s1614_s1 + $0xf8] sm:$0xff]  ;;  %760 = vst [vmem:[%s1613_s2 + $0x2e8] sm:$0xff] %v759_v29  ;;  %v765_v32 = vld [vmem:[%s1614_s1 + $0x100] sm:$0xff] }
  0x31   :  { %762 = vst [vmem:[%s1613_s2 + $0x2f0] sm:$0xff] %v761_v30  ;;  %764 = vst [vmem:[%s1613_s2 + $0x2f8] sm:$0xff] %v763_v31  ;;  %v767_v33 = vld [vmem:[%s1614_s1 + $0x108] sm:$0xff]  ;;  %v769_v34 = vld [vmem:[%s1614_s1 + $0x110] sm:$0xff] }
  0x32   :  { %766 = vst [vmem:[%s1613_s2 + $0x300] sm:$0xff] %v765_v32  ;;  %768 = vst [vmem:[%s1613_s2 + $0x308] sm:$0xff] %v767_v33  ;;  %v771_v35 = vld [vmem:[%s1614_s1 + $0x118] sm:$0xff]  ;;  %v773_v36 = vld [vmem:[%s1614_s1 + $0x120] sm:$0xff] }
  0x33   :  { %770 = vst [vmem:[%s1613_s2 + $0x310] sm:$0xff] %v769_v34  ;;  %v775_v37 = vld [vmem:[%s1614_s1 + $0x128] sm:$0xff]  ;;  %772 = vst [vmem:[%s1613_s2 + $0x318] sm:$0xff] %v771_v35  ;;  %v777_v38 = vld [vmem:[%s1614_s1 + $0x130] sm:$0xff] }
  0x34   :  { %774 = vst [vmem:[%s1613_s2 + $0x320] sm:$0xff] %v773_v36  ;;  %776 = vst [vmem:[%s1613_s2 + $0x328] sm:$0xff] %v775_v37  ;;  %v779_v39 = vld [vmem:[%s1614_s1 + $0x138] sm:$0xff]  ;;  %v781_v40 = vld [vmem:[%s1614_s1 + $0x140] sm:$0xff] }
  0x35   :  { %778 = vst [vmem:[%s1613_s2 + $0x330] sm:$0xff] %v777_v38  ;;  %780 = vst [vmem:[%s1613_s2 + $0x338] sm:$0xff] %v779_v39  ;;  %v783_v41 = vld [vmem:[%s1614_s1 + $0x148] sm:$0xff]  ;;  %v785_v42 = vld [vmem:[%s1614_s1 + $0x150] sm:$0xff] }
  0x36   :  { %782 = vst [vmem:[%s1613_s2 + $0x340] sm:$0xff] %v781_v40  ;;  %v787_v43 = vld [vmem:[%s1614_s1 + $0x158] sm:$0xff]  ;;  %784 = vst [vmem:[%s1613_s2 + $0x348] sm:$0xff] %v783_v41  ;;  %v789_v44 = vld [vmem:[%s1614_s1 + $0x160] sm:$0xff] }
  0x37   :  { %786 = vst [vmem:[%s1613_s2 + $0x350] sm:$0xff] %v785_v42  ;;  %788 = vst [vmem:[%s1613_s2 + $0x358] sm:$0xff] %v787_v43  ;;  %v791_v45 = vld [vmem:[%s1614_s1 + $0x168] sm:$0xff]  ;;  %v793_v46 = vld [vmem:[%s1614_s1 + $0x170] sm:$0xff] }
  0x38   :  { %790 = vst [vmem:[%s1613_s2 + $0x360] sm:$0xff] %v789_v44  ;;  %792 = vst [vmem:[%s1613_s2 + $0x368] sm:$0xff] %v791_v45  ;;  %v795_v47 = vld [vmem:[%s1614_s1 + $0x178] sm:$0xff]  ;;  %v797_v48 = vld [vmem:[%s1614_s1 + $0x180] sm:$0xff] }
  0x39   :  { %794 = vst [vmem:[%s1613_s2 + $0x370] sm:$0xff] %v793_v46  ;;  %v799_v49 = vld [vmem:[%s1614_s1 + $0x188] sm:$0xff]  ;;  %796 = vst [vmem:[%s1613_s2 + $0x378] sm:$0xff] %v795_v47  ;;  %v801_v50 = vld [vmem:[%s1614_s1 + $0x190] sm:$0xff] }
  0x3a   :  { %798 = vst [vmem:[%s1613_s2 + $0x380] sm:$0xff] %v797_v48  ;;  %800 = vst [vmem:[%s1613_s2 + $0x388] sm:$0xff] %v799_v49  ;;  %v803_v51 = vld [vmem:[%s1614_s1 + $0x198] sm:$0xff]  ;;  %v805_v52 = vld [vmem:[%s1614_s1 + $0x1a0] sm:$0xff] }
  0x3b   :  { %802 = vst [vmem:[%s1613_s2 + $0x390] sm:$0xff] %v801_v50  ;;  %804 = vst [vmem:[%s1613_s2 + $0x398] sm:$0xff] %v803_v51  ;;  %v807_v53 = vld [vmem:[%s1614_s1 + $0x1a8] sm:$0xff]  ;;  %v809_v54 = vld [vmem:[%s1614_s1 + $0x1b0] sm:$0xff] }
  0x3c   :  { %806 = vst [vmem:[%s1613_s2 + $0x3a0] sm:$0xff] %v805_v52  ;;  %v811_v55 = vld [vmem:[%s1614_s1 + $0x1b8] sm:$0xff]  ;;  %808 = vst [vmem:[%s1613_s2 + $0x3a8] sm:$0xff] %v807_v53  ;;  %v813_v56 = vld [vmem:[%s1614_s1 + $0x1c0] sm:$0xff] }
  0x3d   :  { %810 = vst [vmem:[%s1613_s2 + $0x3b0] sm:$0xff] %v809_v54  ;;  %812 = vst [vmem:[%s1613_s2 + $0x3b8] sm:$0xff] %v811_v55  ;;  %v815_v57 = vld [vmem:[%s1614_s1 + $0x1c8] sm:$0xff]  ;;  %v817_v58 = vld [vmem:[%s1614_s1 + $0x1d0] sm:$0xff] }
  0x3e   :  { %814 = vst [vmem:[%s1613_s2 + $0x3c0] sm:$0xff] %v813_v56  ;;  %816 = vst [vmem:[%s1613_s2 + $0x3c8] sm:$0xff] %v815_v57  ;;  %v819_v59 = vld [vmem:[%s1614_s1 + $0x1d8] sm:$0xff]  ;;  %v821_v60 = vld [vmem:[%s1614_s1 + $0x1e0] sm:$0xff] }
  0x3f   :  { %818 = vst [vmem:[%s1613_s2 + $0x3d0] sm:$0xff] %v817_v58  ;;  %v823_v61 = vld [vmem:[%s1614_s1 + $0x1e8] sm:$0xff]  ;;  %820 = vst [vmem:[%s1613_s2 + $0x3d8] sm:$0xff] %v819_v59  ;;  %v825_v62 = vld [vmem:[%s1614_s1 + $0x1f0] sm:$0xff] }
  0x40   :  { %822 = vst [vmem:[%s1613_s2 + $0x3e0] sm:$0xff] %v821_v60  ;;  %824 = vst [vmem:[%s1613_s2 + $0x3e8] sm:$0xff] %v823_v61  ;;  %v827_v63 = vld [vmem:[%s1614_s1 + $0x1f8] sm:$0xff] }
  0x41   :  { %826 = vst [vmem:[%s1613_s2 + $0x3f0] sm:$0xff] %v825_v62  ;;  %828 = vst [vmem:[%s1613_s2 + $0x3f8] sm:$0xff] %v827_v63 }

// kernel: complex_casorati_constraint.1
= control target key start
LH: loop header
LB: loop body
LE: loop exit
PB: predicated region body
PF: predicated region fallthrough
CT: control target
= control target key end

     0   :  { %s533_s9 = smov 0   ;;  %s927_s0 = inlined_call_operand.vmem [shape: f32[2,2,2048], index: 0, kind: input, shape index: {}]   ;;  %s928_s1 = inlined_call_operand.vmem [shape: f32[2,2048], index: 1, kind: output, shape index: {0}]   ;;  %s929_s2 = inlined_call_operand.vmem [shape: f32[2,2048], index: 2, kind: output, shape index: {1}]  }
   0x1 LB: > { %p430_p0 = scmp.ne.s32.totalorder %s516_s9, 0  ;;  %s516_s9 = sphi %s533_s9, %s13_s9  }
   0x2   : > { %v36_v0 = vld [vmem:[%s927_s0] sm:$0x1] (!%p430_p0)  ;;  %v40_v2 = vld [vmem:[%s927_s0 + $0x2] sm:$0x1] (!%p430_p0)  ;;  %v44_v4 = vld [vmem:[%s927_s0 + $0x4] sm:$0x1] (!%p430_p0) }
   0x3   : > { %18 = sbr.rel (%p430_p0) target bundleno = 27 (0x1b), region = 12  ;;  %v38_v1 = vld [vmem:[%s927_s0 + $0x20] sm:$0x1] (!%p430_p0)  ;;  %37 = vst [vmem:[%s928_s1] sm:$0x1] (!%p430_p0), %v36_v0  ;;  %41 = vst [vmem:[%s928_s1 + $0x2] sm:$0x1] (!%p430_p0), %v40_v2 }
   0x4   : > { %39 = vst [vmem:[%s928_s1 + $0x1] sm:$0x1] (!%p430_p0), %v38_v1  ;;  %v42_v3 = vld [vmem:[%s927_s0 + $0x22] sm:$0x1] (!%p430_p0)  ;;  %v46_v5 = vld [vmem:[%s927_s0 + $0x24] sm:$0x1] (!%p430_p0) }
   0x5   : > { %43 = vst [vmem:[%s928_s1 + $0x3] sm:$0x1] (!%p430_p0), %v42_v3  ;;  %45 = vst [vmem:[%s928_s1 + $0x4] sm:$0x1] (!%p430_p0), %v44_v4  ;;  %v48_v6 = vld [vmem:[%s927_s0 + $0x6] sm:$0x1] (!%p430_p0) }
   0x6   : > { %47 = vst [vmem:[%s928_s1 + $0x5] sm:$0x1] (!%p430_p0), %v46_v5  ;;  %v50_v7 = vld [vmem:[%s927_s0 + $0x26] sm:$0x1] (!%p430_p0)  ;;  %v52_v8 = vld [vmem:[%s927_s0 + $0x8] sm:$0x1] (!%p430_p0) }
   0x7   : > { %49 = vst [vmem:[%s928_s1 + $0x6] sm:$0x1] (!%p430_p0), %v48_v6  ;;  %51 = vst [vmem:[%s928_s1 + $0x7] sm:$0x1] (!%p430_p0), %v50_v7  ;;  %v54_v9 = vld [vmem:[%s927_s0 + $0x28] sm:$0x1] (!%p430_p0) }
   0x8   : > { %53 = vst [vmem:[%s928_s1 + $0x8] sm:$0x1] (!%p430_p0), %v52_v8  ;;  %v56_v10 = vld [vmem:[%s927_s0 + $0xa] sm:$0x1] (!%p430_p0)  ;;  %55 = vst [vmem:[%s928_s1 + $0x9] sm:$0x1] (!%p430_p0), %v54_v9 }
   0x9   : > { %v58_v11 = vld [vmem:[%s927_s0 + $0x2a] sm:$0x1] (!%p430_p0)  ;;  %57 = vst [vmem:[%s928_s1 + $0xa] sm:$0x1] (!%p430_p0), %v56_v10  ;;  %v60_v12 = vld [vmem:[%s927_s0 + $0xc] sm:$0x1] (!%p430_p0) }
   0xa   : > { %59 = vst [vmem:[%s928_s1 + $0xb] sm:$0x1] %v58_v11  ;;  %v62_v13 = vld [vmem:[%s927_s0 + $0x2c] sm:$0x1]  ;;  %v64_v14 = vld [vmem:[%s927_s0 + $0xe] sm:$0x1] }
   0xb   : > { %61 = vst [vmem:[%s928_s1 + $0xc] sm:$0x1] %v60_v12  ;;  %63 = vst [vmem:[%s928_s1 + $0xd] sm:$0x1] %v62_v13  ;;  %v66_v15 = vld [vmem:[%s927_s0 + $0x2e] sm:$0x1] }
   0xc   : > { %65 = vst [vmem:[%s928_s1 + $0xe] sm:$0x1] %v64_v14  ;;  %v68_v16 = vld [vmem:[%s927_s0 + $0x10] sm:$0x1]  ;;  %67 = vst [vmem:[%s928_s1 + $0xf] sm:$0x1] %v66_v15 }
   0xd   : > { %v70_v17 = vld [vmem:[%s927_s0 + $0x30] sm:$0x1]  ;;  %69 = vst [vmem:[%s928_s1 + $0x10] sm:$0x1] %v68_v16  ;;  %v72_v18 = vld [vmem:[%s927_s0 + $0x12] sm:$0x1] }
   0xe   : > { %71 = vst [vmem:[%s928_s1 + $0x11] sm:$0x1] %v70_v17  ;;  %v74_v19 = vld [vmem:[%s927_s0 + $0x32] sm:$0x1]  ;;  %v76_v20 = vld [vmem:[%s927_s0 + $0x14] sm:$0x1] }
   0xf   : > { %73 = vst [vmem:[%s928_s1 + $0x12] sm:$0x1] %v72_v18  ;;  %75 = vst [vmem:[%s928_s1 + $0x13] sm:$0x1] %v74_v19  ;;  %v78_v21 = vld [vmem:[%s927_s0 + $0x34] sm:$0x1] }
  0x10   : > { %77 = vst [vmem:[%s928_s1 + $0x14] sm:$0x1] %v76_v20  ;;  %v80_v22 = vld [vmem:[%s927_s0 + $0x16] sm:$0x1]  ;;  %79 = vst [vmem:[%s928_s1 + $0x15] sm:$0x1] %v78_v21 }
  0x11   : > { %v82_v23 = vld [vmem:[%s927_s0 + $0x36] sm:$0x1]  ;;  %81 = vst [vmem:[%s928_s1 + $0x16] sm:$0x1] %v80_v22  ;;  %v84_v24 = vld [vmem:[%s927_s0 + $0x18] sm:$0x1] }
  0x12   : > { %83 = vst [vmem:[%s928_s1 + $0x17] sm:$0x1] %v82_v23  ;;  %v86_v25 = vld [vmem:[%s927_s0 + $0x38] sm:$0x1]  ;;  %v88_v26 = vld [vmem:[%s927_s0 + $0x1a] sm:$0x1] }
  0x13   : > { %85 = vst [vmem:[%s928_s1 + $0x18] sm:$0x1] %v84_v24  ;;  %87 = vst [vmem:[%s928_s1 + $0x19] sm:$0x1] %v86_v25  ;;  %v90_v27 = vld [vmem:[%s927_s0 + $0x3a] sm:$0x1] }
  0x14   : > { %89 = vst [vmem:[%s928_s1 + $0x1a] sm:$0x1] %v88_v26  ;;  %v92_v28 = vld [vmem:[%s927_s0 + $0x1c] sm:$0x1]  ;;  %91 = vst [vmem:[%s928_s1 + $0x1b] sm:$0x1] %v90_v27 }
  0x15   : > { %v94_v29 = vld [vmem:[%s927_s0 + $0x3c] sm:$0x1]  ;;  %93 = vst [vmem:[%s928_s1 + $0x1c] sm:$0x1] %v92_v28  ;;  %v96_v30 = vld [vmem:[%s927_s0 + $0x1e] sm:$0x1] }
  0x16   : > { %95 = vst [vmem:[%s928_s1 + $0x1d] sm:$0x1] %v94_v29  ;;  %v98_v31 = vld [vmem:[%s927_s0 + $0x3e] sm:$0x1]  ;;  %97 = vst [vmem:[%s928_s1 + $0x1e] sm:$0x1] %v96_v30 }
  0x17   : > { %99 = vst [vmem:[%s928_s1 + $0x1f] sm:$0x1] %v98_v31 }
  0x18   : > { %194 = vsyncadd [#allocation2], 512 }
  0x19   : > { %510 = dma.done.wait [#allocation2], 512 }
  0x1a   : > { %511 = vsyncadd [#allocation2], 4294966784 }
  0x1b PF: > { %p431_p1 = scmp.ne.s32.totalorder %s516_s9, 1 }
  0x1c   : > { %v464_v32 = vld [vmem:[%s927_s0 + $0x1] sm:$0x1] (!%p431_p1)  ;;  %v466_v34 = vld [vmem:[%s927_s0 + $0x3] sm:$0x1] (!%p431_p1)  ;;  %v468_v36 = vld [vmem:[%s927_s0 + $0x5] sm:$0x1] (!%p431_p1) }
  0x1d   : > { %201 = sbr.rel (%p431_p1) target bundleno = 53 (0x35), region = 53  ;;  %v465_v33 = vld [vmem:[%s927_s0 + $0x21] sm:$0x1] (!%p431_p1)  ;;  %222 = vst [vmem:[%s929_s2] sm:$0x1] (!%p431_p1), %v464_v32  ;;  %226 = vst [vmem:[%s929_s2 + $0x2] sm:$0x1] (!%p431_p1), %v466_v34 }
  0x1e   : > { %224 = vst [vmem:[%s929_s2 + $0x1] sm:$0x1] (!%p431_p1), %v465_v33  ;;  %v467_v35 = vld [vmem:[%s927_s0 + $0x23] sm:$0x1] (!%p431_p1)  ;;  %v469_v37 = vld [vmem:[%s927_s0 + $0x25] sm:$0x1] (!%p431_p1) }
  0x1f   : > { %228 = vst [vmem:[%s929_s2 + $0x3] sm:$0x1] (!%p431_p1), %v467_v35  ;;  %230 = vst [vmem:[%s929_s2 + $0x4] sm:$0x1] (!%p431_p1), %v468_v36  ;;  %v470_v38 = vld [vmem:[%s927_s0 + $0x7] sm:$0x1] (!%p431_p1) }
  0x20   : > { %232 = vst [vmem:[%s929_s2 + $0x5] sm:$0x1] (!%p431_p1), %v469_v37  ;;  %v471_v39 = vld [vmem:[%s927_s0 + $0x27] sm:$0x1] (!%p431_p1)  ;;  %v472_v40 = vld [vmem:[%s927_s0 + $0x9] sm:$0x1] (!%p431_p1) }
  0x21   : > { %234 = vst [vmem:[%s929_s2 + $0x6] sm:$0x1] (!%p431_p1), %v470_v38  ;;  %236 = vst [vmem:[%s929_s2 + $0x7] sm:$0x1] (!%p431_p1), %v471_v39  ;;  %v473_v41 = vld [vmem:[%s927_s0 + $0x29] sm:$0x1] (!%p431_p1) }
  0x22   : > { %238 = vst [vmem:[%s929_s2 + $0x8] sm:$0x1] (!%p431_p1), %v472_v40  ;;  %v474_v42 = vld [vmem:[%s927_s0 + $0xb] sm:$0x1] (!%p431_p1)  ;;  %240 = vst [vmem:[%s929_s2 + $0x9] sm:$0x1] (!%p431_p1), %v473_v41 }
  0x23   : > { %v475_v43 = vld [vmem:[%s927_s0 + $0x2b] sm:$0x1] (!%p431_p1)  ;;  %242 = vst [vmem:[%s929_s2 + $0xa] sm:$0x1] (!%p431_p1), %v474_v42  ;;  %v476_v44 = vld [vmem:[%s927_s0 + $0xd] sm:$0x1] (!%p431_p1) }
  0x24   : > { %244 = vst [vmem:[%s929_s2 + $0xb] sm:$0x1] %v475_v43  ;;  %v477_v45 = vld [vmem:[%s927_s0 + $0x2d] sm:$0x1]  ;;  %v478_v46 = vld [vmem:[%s927_s0 + $0xf] sm:$0x1] }
  0x25   : > { %246 = vst [vmem:[%s929_s2 + $0xc] sm:$0x1] %v476_v44  ;;  %248 = vst [vmem:[%s929_s2 + $0xd] sm:$0x1] %v477_v45  ;;  %v479_v47 = vld [vmem:[%s927_s0 + $0x2f] sm:$0x1] }
  0x26   : > { %250 = vst [vmem:[%s929_s2 + $0xe] sm:$0x1] %v478_v46  ;;  %v480_v48 = vld [vmem:[%s927_s0 + $0x11] sm:$0x1]  ;;  %252 = vst [vmem:[%s929_s2 + $0xf] sm:$0x1] %v479_v47 }
  0x27   : > { %v481_v49 = vld [vmem:[%s927_s0 + $0x31] sm:$0x1]  ;;  %254 = vst [vmem:[%s929_s2 + $0x10] sm:$0x1] %v480_v48  ;;  %v482_v50 = vld [vmem:[%s927_s0 + $0x13] sm:$0x1] }
  0x28   : > { %256 = vst [vmem:[%s929_s2 + $0x11] sm:$0x1] %v481_v49  ;;  %v483_v51 = vld [vmem:[%s927_s0 + $0x33] sm:$0x1]  ;;  %v484_v52 = vld [vmem:[%s927_s0 + $0x15] sm:$0x1] }
  0x29   : > { %258 = vst [vmem:[%s929_s2 + $0x12] sm:$0x1] %v482_v50  ;;  %260 = vst [vmem:[%s929_s2 + $0x13] sm:$0x1] %v483_v51  ;;  %v485_v53 = vld [vmem:[%s927_s0 + $0x35] sm:$0x1] }
  0x2a   : > { %262 = vst [vmem:[%s929_s2 + $0x14] sm:$0x1] %v484_v52  ;;  %v486_v54 = vld [vmem:[%s927_s0 + $0x17] sm:$0x1]  ;;  %264 = vst [vmem:[%s929_s2 + $0x15] sm:$0x1] %v485_v53 }
  0x2b   : > { %v487_v55 = vld [vmem:[%s927_s0 + $0x37] sm:$0x1]  ;;  %266 = vst [vmem:[%s929_s2 + $0x16] sm:$0x1] %v486_v54  ;;  %v488_v56 = vld [vmem:[%s927_s0 + $0x19] sm:$0x1] }
  0x2c   : > { %268 = vst [vmem:[%s929_s2 + $0x17] sm:$0x1] %v487_v55  ;;  %v489_v57 = vld [vmem:[%s927_s0 + $0x39] sm:$0x1]  ;;  %v490_v58 = vld [vmem:[%s927_s0 + $0x1b] sm:$0x1] }
  0x2d   : > { %270 = vst [vmem:[%s929_s2 + $0x18] sm:$0x1] %v488_v56  ;;  %272 = vst [vmem:[%s929_s2 + $0x19] sm:$0x1] %v489_v57  ;;  %v491_v59 = vld [vmem:[%s927_s0 + $0x3b] sm:$0x1] }
  0x2e   : > { %274 = vst [vmem:[%s929_s2 + $0x1a] sm:$0x1] %v490_v58  ;;  %v492_v60 = vld [vmem:[%s927_s0 + $0x1d] sm:$0x1]  ;;  %276 = vst [vmem:[%s929_s2 + $0x1b] sm:$0x1] %v491_v59 }
  0x2f   : > { %v493_v61 = vld [vmem:[%s927_s0 + $0x3d] sm:$0x1]  ;;  %278 = vst [vmem:[%s929_s2 + $0x1c] sm:$0x1] %v492_v60  ;;  %v494_v62 = vld [vmem:[%s927_s0 + $0x1f] sm:$0x1] }
  0x30   : > { %280 = vst [vmem:[%s929_s2 + $0x1d] sm:$0x1] %v493_v61  ;;  %v495_v63 = vld [vmem:[%s927_s0 + $0x3f] sm:$0x1]  ;;  %282 = vst [vmem:[%s929_s2 + $0x1e] sm:$0x1] %v494_v62 }
  0x31   : > { %284 = vst [vmem:[%s929_s2 + $0x1f] sm:$0x1] %v495_v63 }
  0x32   : > { %379 = vsyncadd [#allocation2 + $0x1], 512 }
  0x33   : > { %512 = dma.done.wait [#allocation2 + $0x1], 512 }
  0x34   : > { %513 = vsyncadd [#allocation2 + $0x1], 4294966784 }
  0x35 PF: > { %s13_s9 = sadd.s32 1, %s516_s9  }
  0x36   : > { %p10_p2 = scmp.ge.s32.totalorder %s13_s9, 2  }
  0x38   :  { %12 = sbr.rel (!%p10_p2) target bundleno = 1 (0x1), region = 132 }
  0x3f   :  { %383 = vsyncmov [#allocation2] }
  0x42   :  { %s384_s23 = vpop.sfrf %383 }
  0x43   :  { %p496_p3 = scmp.ne.s32.totalorder %s384_s23, 0 }
  0x45   :  { %388 = shalt.err (%p496_p3)  }
  0x46   :  { %390 = vsyncmov [#allocation2 + $0x1] }
  0x49   :  { %s391_s24 = vpop.sfrf %390 }
  0x4a   :  { %p497_p4 = scmp.ne.s32.totalorder %s391_s24, 0 }
  0x4c   :  { %395 = shalt.err (%p497_p4)  }

</bundles_post_ra>
